<compile_context>
chip_gen: v7x
topology: tpu7x:2x2x1
jax: 0.10.0
libtpu: 0.0.40
codegen_flags: <defaults>
</compile_context>

<pallas_src>
import functools

import jax
import jax.numpy as jnp
from jax.experimental import pallas as pl
from jax.experimental.pallas import tpu as pltpu


NUM_CLASSES = 2
CLS_PAD = 128  # classifier output padded to one full lane width (lane-dense store)


def _round_up(x, m):
    return ((x + m - 1) // m) * m


def _default_max_batch_tile():
    # v5e's MXU is 128 rows; v6e/v7x are 256.  Beyond the MXU row width a larger
    # tile only grows the f32 intermediates (vreg/VMEM pressure) on v5e.
    try:
        kind = jax.devices()[0].device_kind.lower()
        if "v5 lite" in kind or "v5e" in kind or "v5lite" in kind:
            return 128
    except Exception:
        pass
    return 256


def _pick_batch_tile(batch, max_tile):
    # bf16 packs (16, 128) per vreg -> keep the tile a multiple of 16.
    if batch <= 16:
        return 16
    # Keep >= 2 grid steps when the batch allows it (v7x shards the "parallel"
    # grid axis over its 2 TensorCores); otherwise one MXU-filling tile.
    half = _round_up((batch + 1) // 2, 16)
    return min(max_tile, half)


def codet5_head_kernel(x_ref,            # (Bt, H)     bf16  EOS-row embeddings
                       w1_ref, b1_ref,   # (H, H) bf16, (1, H) f32
                       w2_ref, b2_ref,   # (H, H) bf16, (1, H) f32
                       wc_ref, bc_ref,   # (H, 128) bf16 (transposed, lane-padded), (1, 128) f32
                       prob_ref):        # (Bt, 128)   f32  probabilities (cols 0:2 valid)
    # --- stand-in encoder MLP (bf16 MXU, f32 accumulate; f32 epilogue for v5e VPU) ---
    h1 = jnp.dot(x_ref[...], w1_ref[...], preferred_element_type=jnp.float32)
    h1 = jnp.maximum(h1 + b1_ref[...], 0.0)
    h2 = jnp.dot(h1.astype(jnp.bfloat16), w2_ref[...],
                 preferred_element_type=jnp.float32)
    h2 = h2 + b2_ref[...]                                              # (Bt, H) f32

    # --- classifier Linear(H, 2) as a lane-padded MXU matmul (N padded to 128) ---
    logits = jnp.dot(h2.astype(jnp.bfloat16), wc_ref[...],
                     preferred_element_type=jnp.float32) + bc_ref[...]  # (Bt, 128)

    # dropout in eval mode is identity; sigmoid -> probabilities; lane-dense store.
    prob_ref[...] = jax.nn.sigmoid(logits)


def _classifier_head(x_eos_bf16, w1, b1, w2, b2, wc_pad, bc_pad, batch_tile):
    Bp, H = x_eos_bf16.shape
    const = lambda i: (0, 0)

    def resident(shape):
        # Constant weights: loaded once, single-buffered (no extra VMEM copy).
        return pl.BlockSpec(shape, const, pipeline_mode=pl.Buffered(1))

    return pl.pallas_call(
        codet5_head_kernel,
        out_shape=jax.ShapeDtypeStruct((Bp, CLS_PAD), jnp.float32),
        grid=(Bp // batch_tile,),
        in_specs=[
            pl.BlockSpec((batch_tile, H), lambda i: (i, 0)),   # x (streamed, double-buffered)
            resident((H, H)), resident((1, H)),                # w1, b1
            resident((H, H)), resident((1, H)),                # w2, b2
            resident((H, CLS_PAD)), resident((1, CLS_PAD)),    # wc, bc (lane-padded)
        ],
        out_specs=pl.BlockSpec((batch_tile, CLS_PAD), lambda i: (i, 0)),
        compiler_params=pltpu.CompilerParams(
            dimension_semantics=("parallel",),
            vmem_limit_bytes=32 * 1024 * 1024),
    )(x_eos_bf16, w1, b1, w2, b2, wc_pad, bc_pad)


def validate_source_ids(source_ids, block_size, eos_token_id):
    """Host-side check mirroring the PyTorch raise; call OUTSIDE the jitted path."""
    ids = jnp.asarray(source_ids).reshape(-1, block_size)
    counts = jnp.sum((ids == eos_token_id).astype(jnp.int32), axis=1)
    if bool(jnp.any(counts != counts[0])):
        raise ValueError("All examples must have the same number of <eos> tokens.")
    if int(counts[0]) == 0:
        raise ValueError("Each example must contain at least one <eos> token.")


def codet5_forward(source_ids, labels, params, *, block_size, pad_token_id,
                   eos_token_id, max_batch_tile=None):
    """Mirrors CodeT5.forward: returns (loss, prob) if labels given, else prob.

    Jit-friendly: no host-side synchronization in this function.
    """
    del pad_token_id  # attention mask at the <eos> row is always 1 (eos != pad)
    source_ids = source_ids.reshape(-1, block_size)
    B, L = source_ids.shape

    # Last <eos> position per row (== [:, -1, :] of the eos-masked view).
    eos_mask = (source_ids == eos_token_id)
    positions = jnp.arange(L, dtype=jnp.int32)[None, :]
    eos_idx = jnp.max(jnp.where(eos_mask, positions, -1), axis=1).astype(jnp.int32)  # (B,)

    # Stand-in encoder is position-wise: gather the EOS row BEFORE the matmuls
    # (L-fold FLOP / DMA cut versus running the MLP on the whole sequence).
    tok_at_eos = jnp.take_along_axis(source_ids, eos_idx[:, None], axis=1)[:, 0]     # (B,)
    x = params["emb_table"][tok_at_eos] + params["pos_table"][eos_idx]               # (B, H) f32
    H = x.shape[1]

    # Classifier weights: PyTorch [out, in] = [2, H] -> transposed, lane-padded
    # to (H, 128) bf16 so the kernel's classifier is one lane-dense MXU pass.
    wc_pad = jnp.zeros((H, CLS_PAD), jnp.bfloat16).at[:, :NUM_CLASSES].set(
        params["wc"].T.astype(jnp.bfloat16))
    bc_pad = jnp.zeros((1, CLS_PAD), jnp.float32).at[:, :NUM_CLASSES].set(params["bc"])

    if max_batch_tile is None:
        max_batch_tile = _default_max_batch_tile()
    batch_tile = _pick_batch_tile(B, max_batch_tile)
    Bp = _round_up(B, batch_tile)
    if Bp != B:
        x = jnp.pad(x, ((0, Bp - B), (0, 0)))

    prob_pad = _classifier_head(x.astype(jnp.bfloat16),
                                params["w1"], params["b1"],
                                params["w2"], params["b2"],
                                wc_pad, bc_pad, batch_tile)
    prob = prob_pad[:B, :NUM_CLASSES]

    if labels is not None:
        # nn.BCELoss()(prob[:, 1], labels.float()), mean reduction; PyTorch clamps
        # each log term at -100.
        p1 = prob[:, 1]
        y = labels.astype(jnp.float32)
        log_p = jnp.maximum(jnp.log(p1), -100.0)
        log_1mp = jnp.maximum(jnp.log1p(-p1), -100.0)
        loss = jnp.mean(-(y * log_p + (1.0 - y) * log_1mp))
        return loss, prob
    return prob


def init_params(key, vocab_size, hidden_size, block_size):
    ks = jax.random.split(key, 6)
    s = 0.02
    return {
        # stand-in encoder tables (f32; gathered in the wrapper)
        "emb_table": s * jax.random.normal(ks[0], (vocab_size, hidden_size), jnp.float32),
        "pos_table": s * jax.random.normal(ks[1], (block_size, hidden_size), jnp.float32),
        # stand-in encoder MLP: bf16 matmul operands, f32 biases
        "w1": (s * jax.random.normal(ks[2], (hidden_size, hidden_size), jnp.float32)
               ).astype(jnp.bfloat16),
        "b1": jnp.zeros((1, hidden_size), jnp.float32),
        "w2": (s * jax.random.normal(ks[3], (hidden_size, hidden_size), jnp.float32)
               ).astype(jnp.bfloat16),
        "b2": jnp.zeros((1, hidden_size), jnp.float32),
        # classifier: PyTorch nn.Linear(H, 2) weight layout [out, in] = [2, H]
        "wc": s * jax.random.normal(ks[4], (2, hidden_size), jnp.float32),
        "bc": 0.01 * jax.random.normal(ks[5], (1, 2), jnp.float32),
    }


if __name__ == "__main__":
    B, L, H, V = 16, 16, 128, 96
    PAD_ID, EOS_ID = 0, 2

    key = jax.random.PRNGKey(0)
    pkey, ikey, lkey = jax.random.split(key, 3)
    params = init_params(pkey, V, H, L)

    # Deterministic token ids in [3, V); exactly one <eos> per row at a varying
    # position, padding after it -> every row has the same number (1) of <eos>.
    ids = jax.random.randint(ikey, (B, L), 3, V, dtype=jnp.int32)
    eos_pos = 4 + (jnp.arange(B, dtype=jnp.int32) % (L - 5))
    cols = jnp.arange(L, dtype=jnp.int32)[None, :]
    ids = jnp.where(cols == eos_pos[:, None], EOS_ID, ids)
    ids = jnp.where(cols > eos_pos[:, None], PAD_ID, ids)

    labels = jax.random.randint(lkey, (B,), 0, 2, dtype=jnp.int32)

    # Host-side validation once, outside the hot (jitted) path.
    validate_source_ids(ids, L, EOS_ID)

    fwd = jax.jit(functools.partial(codet5_forward, block_size=L,
                                    pad_token_id=PAD_ID, eos_token_id=EOS_ID))

    loss, prob = fwd(ids, labels, params)
    jax.block_until_ready((loss, prob))
    assert prob.shape == (B, 2)
    assert bool(jnp.all((prob >= 0.0) & (prob <= 1.0)))
    assert bool(jnp.isfinite(loss))

    # Inference path (labels=None) also exercised.
    prob_only = fwd(ids, None, params)
    jax.block_until_ready(prob_only)
    assert prob_only.shape == (B, 2)

    print("KERNEL_OK")
</pallas_src>

<mosaic_0001>
module attributes {stable_mosaic.version = 11 : i64} {
  func.func @codet5_head_kernel(%arg0: i32, %arg1: memref<16x128xbf16, #tpu.memory_space<vmem>>, %arg2: memref<128x128xbf16, #tpu.memory_space<vmem>>, %arg3: memref<1x128xf32, #tpu.memory_space<vmem>>, %arg4: memref<128x128xbf16, #tpu.memory_space<vmem>>, %arg5: memref<1x128xf32, #tpu.memory_space<vmem>>, %arg6: memref<128x128xbf16, #tpu.memory_space<vmem>>, %arg7: memref<1x128xf32, #tpu.memory_space<vmem>>, %arg8: memref<16x128xf32, #tpu.memory_space<vmem>>) attributes {dimension_semantics = [#tpu.dimension_semantics<parallel>], iteration_bounds = array<i64: 1>, scalar_prefetch = 0 : i64, scratch_operands = 0 : i64, tpu.core_type = #tpu.core_type<tc>, window_params = [{transform_indices = @transform_0, window_bounds = array<i64: 16, 128>}, {pipeline_mode = #tpu.pipeline_mode<synchronous>, transform_indices = @transform_1, window_bounds = array<i64: 128, 128>}, {pipeline_mode = #tpu.pipeline_mode<synchronous>, transform_indices = @transform_2, window_bounds = array<i64: 1, 128>}, {pipeline_mode = #tpu.pipeline_mode<synchronous>, transform_indices = @transform_3, window_bounds = array<i64: 128, 128>}, {pipeline_mode = #tpu.pipeline_mode<synchronous>, transform_indices = @transform_4, window_bounds = array<i64: 1, 128>}, {pipeline_mode = #tpu.pipeline_mode<synchronous>, transform_indices = @transform_5, window_bounds = array<i64: 128, 128>}, {pipeline_mode = #tpu.pipeline_mode<synchronous>, transform_indices = @transform_6, window_bounds = array<i64: 1, 128>}, {transform_indices = @transform_7, window_bounds = array<i64: 16, 128>}]} {
    %c0 = arith.constant 0 : index
    %c0_0 = arith.constant 0 : index
    %0 = vector.load %arg1[%c0, %c0_0] : memref<16x128xbf16, #tpu.memory_space<vmem>>, vector<16x128xbf16>
    %c0_1 = arith.constant 0 : index
    %c0_2 = arith.constant 0 : index
    %1 = vector.load %arg2[%c0_1, %c0_2] : memref<128x128xbf16, #tpu.memory_space<vmem>>, vector<128x128xbf16>
    %cst = arith.constant dense<0.000000e+00> : vector<16x128xf32>
    %2 = tpu.matmul %0, %1, %cst {dimension_numbers = #tpu.dot_dimension_numbers<[1], [0], [0], [1], [0, 0, 1, 1], [], []>} : vector<16x128xbf16>, vector<128x128xbf16>, vector<16x128xf32> -> vector<16x128xf32>
    %c0_3 = arith.constant 0 : index
    %c0_4 = arith.constant 0 : index
    %3 = vector.load %arg3[%c0_3, %c0_4] : memref<1x128xf32, #tpu.memory_space<vmem>>, vector<1x128xf32>
    %4 = vector.broadcast %3 : vector<1x128xf32> to vector<16x128xf32>
    %5 = arith.addf %2, %4 : vector<16x128xf32>
    %cst_5 = arith.constant 0.000000e+00 : f32
    %6 = vector.broadcast %cst_5 : f32 to vector<16x128xf32>
    %7 = arith.maximumf %5, %6 : vector<16x128xf32>
    %8 = arith.truncf %7 : vector<16x128xf32> to vector<16x128xbf16>
    %c0_6 = arith.constant 0 : index
    %c0_7 = arith.constant 0 : index
    %9 = vector.load %arg4[%c0_6, %c0_7] : memref<128x128xbf16, #tpu.memory_space<vmem>>, vector<128x128xbf16>
    %cst_8 = arith.constant dense<0.000000e+00> : vector<16x128xf32>
    %10 = tpu.matmul %8, %9, %cst_8 {dimension_numbers = #tpu.dot_dimension_numbers<[1], [0], [0], [1], [0, 0, 1, 1], [], []>} : vector<16x128xbf16>, vector<128x128xbf16>, vector<16x128xf32> -> vector<16x128xf32>
    %c0_9 = arith.constant 0 : index
    %c0_10 = arith.constant 0 : index
    %11 = vector.load %arg5[%c0_9, %c0_10] : memref<1x128xf32, #tpu.memory_space<vmem>>, vector<1x128xf32>
    %12 = vector.broadcast %11 : vector<1x128xf32> to vector<16x128xf32>
    %13 = arith.addf %10, %12 : vector<16x128xf32>
    %14 = arith.truncf %13 : vector<16x128xf32> to vector<16x128xbf16>
    %c0_11 = arith.constant 0 : index
    %c0_12 = arith.constant 0 : index
    %15 = vector.load %arg6[%c0_11, %c0_12] : memref<128x128xbf16, #tpu.memory_space<vmem>>, vector<128x128xbf16>
    %cst_13 = arith.constant dense<0.000000e+00> : vector<16x128xf32>
    %16 = tpu.matmul %14, %15, %cst_13 {dimension_numbers = #tpu.dot_dimension_numbers<[1], [0], [0], [1], [0, 0, 1, 1], [], []>} : vector<16x128xbf16>, vector<128x128xbf16>, vector<16x128xf32> -> vector<16x128xf32>
    %c0_14 = arith.constant 0 : index
    %c0_15 = arith.constant 0 : index
    %17 = vector.load %arg7[%c0_14, %c0_15] : memref<1x128xf32, #tpu.memory_space<vmem>>, vector<1x128xf32>
    %18 = vector.broadcast %17 : vector<1x128xf32> to vector<16x128xf32>
    %19 = arith.addf %16, %18 : vector<16x128xf32>
    %20 = arith.negf %19 : vector<16x128xf32>
    %21 = math.exp %20 : vector<16x128xf32>
    %cst_16 = arith.constant 1.000000e+00 : f32
    %22 = vector.broadcast %cst_16 : f32 to vector<16x128xf32>
    %23 = arith.addf %22, %21 : vector<16x128xf32>
    %24 = arith.divf %22, %23 : vector<16x128xf32>
    %c0_17 = arith.constant 0 : index
    %c0_18 = arith.constant 0 : index
    %25 = vector.load %arg8[%c0_17, %c0_18] : memref<16x128xf32, #tpu.memory_space<vmem>>, vector<16x128xf32>
    tpu.vector_store %arg8[%c0_17, %c0_18], %24 {strides = array<i32>} : memref<16x128xf32, #tpu.memory_space<vmem>>, vector<16x128xf32>,
    return
  }
  func.func @transform_0(%arg0: i32) -> (i32, i32) {
    %c0_i32 = arith.constant 0 : i32
    %c0_i32_0 = arith.constant 0 : i32
    return %arg0, %c0_i32 : i32, i32
  }
  func.func @transform_1(%arg0: i32) -> (i32, i32) {
    %c0_i32 = arith.constant 0 : i32
    %c0_i32_0 = arith.constant 0 : i32
    %c0_i32_1 = arith.constant 0 : i32
    return %c0_i32, %c0_i32_0 : i32, i32
  }
  func.func @transform_2(%arg0: i32) -> (i32, i32) {
    %c0_i32 = arith.constant 0 : i32
    %c0_i32_0 = arith.constant 0 : i32
    %c0_i32_1 = arith.constant 0 : i32
    return %c0_i32, %c0_i32_0 : i32, i32
  }
  func.func @transform_3(%arg0: i32) -> (i32, i32) {
    %c0_i32 = arith.constant 0 : i32
    %c0_i32_0 = arith.constant 0 : i32
    %c0_i32_1 = arith.constant 0 : i32
    return %c0_i32, %c0_i32_0 : i32, i32
  }
  func.func @transform_4(%arg0: i32) -> (i32, i32) {
    %c0_i32 = arith.constant 0 : i32
    %c0_i32_0 = arith.constant 0 : i32
    %c0_i32_1 = arith.constant 0 : i32
    return %c0_i32, %c0_i32_0 : i32, i32
  }
  func.func @transform_5(%arg0: i32) -> (i32, i32) {
    %c0_i32 = arith.constant 0 : i32
    %c0_i32_0 = arith.constant 0 : i32
    %c0_i32_1 = arith.constant 0 : i32
    return %c0_i32, %c0_i32_0 : i32, i32
  }
  func.func @transform_6(%arg0: i32) -> (i32, i32) {
    %c0_i32 = arith.constant 0 : i32
    %c0_i32_0 = arith.constant 0 : i32
    %c0_i32_1 = arith.constant 0 : i32
    return %c0_i32, %c0_i32_0 : i32, i32
  }
  func.func @transform_7(%arg0: i32) -> (i32, i32) {
    %c0_i32 = arith.constant 0 : i32
    %c0_i32_0 = arith.constant 0 : i32
    return %arg0, %c0_i32 : i32, i32
  }
}

</mosaic_0001>

<bundles_post_ra>
// kernel: codet5_forward.1
= control target key start
LH: loop header
LB: loop body
LE: loop exit
PB: predicated region body
PF: predicated region fallthrough
CT: control target
= control target key end

     0   :  { %v545_v0 = vmov 0.0   ;;  %vm546_vm0 = vmmov 0   ;;  %s707_s1 = inlined_call_operand.vmem [shape: bf16[128,128], index: 1, kind: input, shape index: {}]   ;;  %s708_s3 = inlined_call_operand.vmem [shape: bf16[128,128], index: 3, kind: input, shape index: {}]   ;;  %s709_s0 = inlined_call_operand.vmem [shape: bf16[16,128], index: 0, kind: input, shape index: {}]   ;;  %s710_s5 = inlined_call_operand.vmem [shape: bf16[128,128], index: 5, kind: input, shape index: {}]   ;;  %s711_s2 = inlined_call_operand.vmem [shape: f32[1,128], index: 2, kind: input, shape index: {}]   ;;  %s712_s4 = inlined_call_operand.vmem [shape: f32[1,128], index: 4, kind: input, shape index: {}]   ;;  %s713_s6 = inlined_call_operand.vmem [shape: f32[1,128], index: 6, kind: input, shape index: {}]   ;;  %s714_s7 = inlined_call_operand.vmem [shape: f32[16,128], index: 7, kind: output, shape index: {}]  }
   0x1   :  { %450 = vmatprep.subr.bf16.mxu0 %v545_v0  ;;  %v512_v1 = vld [vmem:[%s707_s1] sm:$0xff]   ;;  %466 = vmatprep.mubr.msk.bf16.mxu0 %vm546_vm0, %v545_v0  ;;  %v513_v2 = vld [vmem:[%s707_s1 + $0x8] sm:$0xff]   ;;  %v514_v3 = vld [vmem:[%s707_s1 + $0x10] sm:$0xff]  }
   0x2   :  { %470 = vmatprep.subr.bf16.mxu1 %v545_v0  ;;  %486 = vmatprep.mubr.msk.bf16.mxu1 %vm546_vm0, %v545_v0  ;;  %v521_v4 = vld [vmem:[%s708_s3] sm:$0xff]   ;;  %v515_v5 = vld [vmem:[%s707_s1 + $0x18] sm:$0xff]   ;;  %v522_v6 = vld [vmem:[%s708_s3 + $0x8] sm:$0xff]  }
   0x3   :  { %451 = vmatpush3.bf16.msra.mxu0 %v512_v1  ;;  %471 = vmatpush3.bf16.msra.mxu1 %v521_v4  ;;  %v516_v7 = vld [vmem:[%s707_s1 + $0x20] sm:$0xff]   ;;  %v523_v8 = vld [vmem:[%s708_s3 + $0x10] sm:$0xff]   ;;  %v517_v9 = vld [vmem:[%s707_s1 + $0x28] sm:$0xff]  }
   0x4   :  { %452 = vmatprep.subr.bf16.mxu0 %v545_v0  ;;  %472 = vmatprep.subr.bf16.mxu1 %v545_v0  ;;  %v524_v10 = vld [vmem:[%s708_s3 + $0x18] sm:$0xff]   ;;  %v518_v11 = vld [vmem:[%s707_s1 + $0x30] sm:$0xff]   ;;  %v525_v12 = vld [vmem:[%s708_s3 + $0x20] sm:$0xff]  }
   0x5   :  { %v519_v13 = vld [vmem:[%s707_s1 + $0x38] sm:$0xff]   ;;  %v526_v14 = vld [vmem:[%s708_s3 + $0x28] sm:$0xff]   ;;  %v520_v15 = vld [vmem:[%s709_s0] sm:$0xff]  }
   0x6   :  { %v527_v16 = vld [vmem:[%s708_s3 + $0x30] sm:$0xff]   ;;  %v528_v17 = vld [vmem:[%s708_s3 + $0x38] sm:$0xff]   ;;  %v529_v18 = vld [vmem:[%s710_s5] sm:$0xff]  }
   0x7   :  { %453 = vmatpush3.bf16.msra.mxu0 %v513_v2  ;;  %473 = vmatpush3.bf16.msra.mxu1 %v522_v6  ;;  %v530_v19 = vld [vmem:[%s710_s5 + $0x8] sm:$0xff]   ;;  %v531_v20 = vld [vmem:[%s710_s5 + $0x10] sm:$0xff]   ;;  %v532_v21 = vld [vmem:[%s710_s5 + $0x18] sm:$0xff]  }
   0x8   :  { %454 = vmatprep.subr.bf16.mxu0 %v545_v0  ;;  %474 = vmatprep.subr.bf16.mxu1 %v545_v0  ;;  %v533_v22 = vld [vmem:[%s710_s5 + $0x20] sm:$0xff]   ;;  %v534_v23 = vld [vmem:[%s710_s5 + $0x28] sm:$0xff]   ;;  %v535_v34 = vld [vmem:[%s710_s5 + $0x30] sm:$0xff]  }
   0x9   :  { %v393_v24 = vld [vmem:[%s711_s2] ss:$0 sm:$0xff]  ;;  %v536_v35 = vld [vmem:[%s710_s5 + $0x38] sm:$0xff]  }
   0xa   :  { %v403_v36 = vld [vmem:[%s712_s4] ss:$0 sm:$0xff] }
   0xb   :  { %455 = vmatpush3.bf16.msra.mxu0 %v514_v3  ;;  %475 = vmatpush3.bf16.msra.mxu1 %v523_v8  ;;  %v412_v44 = vld [vmem:[%s713_s6] ss:$0 sm:$0xff] }
   0xc   :  { %456 = vmatprep.subr.bf16.mxu0 %v545_v0  ;;  %476 = vmatprep.subr.bf16.mxu1 %v545_v0 }
   0xf   :  { %457 = vmatpush3.bf16.msra.mxu0 %v515_v5  ;;  %477 = vmatpush3.bf16.msra.mxu1 %v524_v10 }
  0x10   :  { %458 = vmatprep.subr.bf16.mxu0 %v545_v0  ;;  %478 = vmatprep.subr.bf16.mxu1 %v545_v0 }
  0x13   :  { %459 = vmatpush3.bf16.msra.mxu0 %v516_v7  ;;  %479 = vmatpush3.bf16.msra.mxu1 %v525_v12 }
  0x14   :  { %460 = vmatprep.subr.bf16.mxu0 %v545_v0  ;;  %480 = vmatprep.subr.bf16.mxu1 %v545_v0 }
  0x17   :  { %461 = vmatpush3.bf16.msra.mxu0 %v517_v9  ;;  %481 = vmatpush3.bf16.msra.mxu1 %v526_v14 }
  0x18   :  { %462 = vmatprep.subr.bf16.mxu0 %v545_v0  ;;  %482 = vmatprep.subr.bf16.mxu1 %v545_v0 }
  0x1b   :  { %463 = vmatpush3.bf16.msra.mxu0 %v518_v11  ;;  %483 = vmatpush3.bf16.msra.mxu1 %v527_v16 }
  0x1c   :  { %464 = vmatprep.subr.bf16.mxu0 %v545_v0  ;;  %484 = vmatprep.subr.bf16.mxu1 %v545_v0 }
  0x1f   :  { %465 = vmatpush3.bf16.msra.mxu0 %v519_v13  ;;  %485 = vmatpush3.bf16.msra.mxu1 %v528_v17 }
  0x20   :  { %490 = vmatprep.subr.bf16.mxu0 %v545_v0 }
  0x22   :  { %467 = vmatmul.mubr.bf16.vlgmr.msra.gmra.mrb[0].mxu0 %v520_v15 }
  0x23   :  { %506 = vmatprep.mubr.msk.bf16.mxu0 %vm546_vm0, %v545_v0  ;;  %491 = vmatpush3.bf16.msra.mxu0 %v529_v18 }
  0x24   :  { %492 = vmatprep.subr.bf16.mxu0 %v545_v0 }
  0x27   :  { %493 = vmatpush3.bf16.msra.mxu0 %v530_v19 }
  0x28   :  { %494 = vmatprep.subr.bf16.mxu0 %v545_v0 }
  0x2b   :  { %495 = vmatpush3.bf16.msra.mxu0 %v531_v20 }
  0x2c   :  { %496 = vmatprep.subr.bf16.mxu0 %v545_v0 }
  0x2f   :  { %497 = vmatpush3.bf16.msra.mxu0 %v532_v21 }
  0x30   :  { %498 = vmatprep.subr.bf16.mxu0 %v545_v0 }
  0x33   :  { %499 = vmatpush3.bf16.msra.mxu0 %v533_v22 }
  0x34   :  { %500 = vmatprep.subr.bf16.mxu0 %v545_v0 }
  0x37   :  { %501 = vmatpush3.bf16.msra.mxu0 %v534_v23 }
  0x38   :  { %502 = vmatprep.subr.bf16.mxu0 %v545_v0 }
  0x3b   :  { %503 = vmatpush3.bf16.msra.mxu0 %v535_v34 }
  0x3c   :  { %504 = vmatprep.subr.bf16.mxu0 %v545_v0 }
  0x3f   :  { %505 = vmatpush3.bf16.msra.mxu0 %v536_v35 }
  0xf5   :  { %v140_v25 = vpop.f32.mrb[0].mxu0 }
  0xf6   :  { %v141_v26 = vadd.f32 %v393_v24, %v140_v25  ;;  %v468_v27 = vpop.f32.mrb[1].mxu0 }
  0xf7   :  { %v143_v28 = vpop.f32.mrb[2].mxu0 }
  0xf8   :  { %v144_v29 = vadd.f32 %v393_v24, %v143_v28  ;;  %v469_v30 = vpop.f32.mrb[3].mxu0  ;;  %v147_v31 = vmax.f32 %v141_v26, 0.0 }
  0xfa   :  { %v148_v32 = vmax.f32 %v144_v29, 0.0 }
  0xfc   :  { %v149_v33 = vpack.c.bf16 %v148_v32, %v147_v31 }
  0xfe   :  { %487 = vmatmul.mubr.bf16.vlgmr.msra.gmra.mrb[0].mxu1 %v149_v33 }
 0x1d1   :  { %v255_v37 = vpop.f32.mrb[0].mxu1 }
 0x1d2   :  { %v488_v38 = vpop.f32.mrb[1].mxu1  ;;  %v256_v40 = vadd.f32 %v403_v36, %v255_v37 }
 0x1d3   :  { %v258_v39 = vpop.f32.mrb[2].mxu1 }
 0x1d4   :  { %v259_v41 = vadd.f32 %v403_v36, %v258_v39  ;;  %v489_v42 = vpop.f32.mrb[3].mxu1 }
 0x1d6   :  { %v262_v43 = vpack.c.bf16 %v259_v41, %v256_v40 }
 0x1d8   :  { %507 = vmatmul.mubr.bf16.vlgmr.msra.gmra.mrb[4].mxu0 %v262_v43 }
 0x2ab   :  { %v368_v45 = vpop.f32.mrb[4].mxu0 }
 0x2ac   :  { %v369_v46 = vadd.f32 %v412_v44, %v368_v45  ;;  %v508_v47 = vpop.f32.mrb[5].mxu0 }
 0x2ad   :  { %v371_v48 = vpop.f32.mrb[6].mxu0 }
 0x2ae   :  { %v421_v49 = vmul.f32 -1.442695, %v369_v46  ;;  %v372_v50 = vadd.f32 %v412_v44, %v371_v48  ;;  %v509_v51 = vpop.f32.mrb[7].mxu0 }
 0x2b0   :  { %537 = vpow2.f32 %v421_v49  ;;  %v422_v52 = vmul.f32 -1.442695, %v372_v50 }
 0x2b2   :  { %539 = vpow2.f32 %v422_v52 }
 0x2ba   :  { %v538_v53 = vpop.eup %537 }
 0x2bb   :  { %v381_v54 = vadd.f32 1.0, %v538_v53 }
 0x2bc   :  { %v540_v55 = vpop.eup %539 }
 0x2bd   :  { %541 = vrcp.f32 %v381_v54  ;;  %v382_v56 = vadd.f32 1.0, %v540_v55 }
 0x2bf   :  { %543 = vrcp.f32 %v382_v56 }
 0x2c7   :  { %v542_v57 = vpop.eup %541 }
 0x2c8   :  { %387 = vst [vmem:[%s714_s7] sm:$0xff] %v542_v57 }
 0x2c9   :  { %v544_v58 = vpop.eup %543 }
 0x2ca   :  { %388 = vst [vmem:[%s714_s7 + $0x8] sm:$0xff] %v544_v58 }

</bundles_post_ra>
